<compile_context>
chip_gen: v7x
topology: tpu7x:2x2x1
jax: 0.10.0
libtpu: 0.0.40
codegen_flags: <defaults>
</compile_context>

<pallas_src>
import functools

import jax
import jax.numpy as jnp
from jax import lax
from jax.experimental import pallas as pl
from jax.experimental.pallas import tpu as pltpu


def _round_up(x, m):
    return ((x + m - 1) // m) * m


_VMEM_SOFT_LIMIT = 16 << 20          # raise vmem_limit_bytes only above this
_FUSED_Y_SCRATCH_LIMIT = 12 << 20    # above this, fall back to the two-call BN path


def _compiler_params(semantics, est_vmem_bytes):
    kw = dict(dimension_semantics=semantics)
    if est_vmem_bytes > _VMEM_SOFT_LIMIT:
        # leave headroom, stay below v7x's 64 MiB physical VMEM per TensorCore
        kw["vmem_limit_bytes"] = min(int(est_vmem_bytes * 1.25) + (4 << 20), 48 << 20)
    return pltpu.CompilerParams(**kw)


# --------------------------------------------------------------------------
# Kernels
# --------------------------------------------------------------------------

def _linear_kernel(x_ref, wt_ref, b_ref, o_ref, *, compute_dtype):
    # type='ori': o = x @ W^T + b.  x tile cast in VMEM (no wrapper HBM pass).
    y = jnp.dot(x_ref[...].astype(compute_dtype), wt_ref[...],
                preferred_element_type=jnp.float32)
    o_ref[...] = (y + b_ref[...]).astype(o_ref.dtype)


def _fused_bn_kernel(x_ref, wt_ref, gb_ref, o_ref,
                     y_scr, sum_scr, sumsq_scr, ss_scr,
                     *, n_rows, tn, compute_dtype):
    # grid = (2, num_tiles), both "arbitrary".
    #   phase 0: matmul into the VMEM y scratch + masked global column sum / sumsq.
    #   phase 1: fold stats + affine once (tile 0), then per-tile fused multiply-add.
    # Linear bias is intentionally dropped: it cancels under BN mean subtraction.
    phase = pl.program_id(0)
    i = pl.program_id(1)
    off = pl.multiple_of(i * tn, tn)

    @pl.when((phase == 0) & (i == 0))
    def _():
        sum_scr[...] = jnp.zeros_like(sum_scr)
        sumsq_scr[...] = jnp.zeros_like(sumsq_scr)

    @pl.when(phase == 0)
    def _():
        y = jnp.dot(x_ref[...].astype(compute_dtype), wt_ref[...],
                    preferred_element_type=jnp.float32)
        # SELECT-mask rows beyond N: the partial last x block may contain garbage
        # (even NaN/Inf) which must not reach the statistics.
        rows = i * tn + lax.broadcasted_iota(jnp.int32, (tn, 1), 0)
        y = jnp.where(rows < n_rows, y, 0.0)
        y_scr[pl.ds(off, tn), :] = y
        sum_scr[...] += jnp.sum(y, axis=0, keepdims=True)
        sumsq_scr[...] += jnp.sum(y * y, axis=0, keepdims=True)

    @pl.when((phase == 1) & (i == 0))
    def _():
        inv_n = 1.0 / n_rows
        mean = sum_scr[...] * inv_n
        var = sumsq_scr[...] * inv_n - mean * mean     # biased variance (torch .train())
        gb = gb_ref[...]                               # packed (2,B): [gamma; beta]
        scale = gb[0:1, :] * lax.rsqrt(var + 1e-5)
        shift = gb[1:2, :] - mean * scale
        ss_scr[...] = jnp.concatenate([scale, shift], axis=0)

    @pl.when(phase == 1)
    def _():
        ss = ss_scr[...]
        o_ref[...] = (y_scr[pl.ds(off, tn), :] * ss[0:1, :]
                      + ss[1:2, :]).astype(o_ref.dtype)


def _linear_psum_kernel(x_ref, wt_ref, y_ref, ps_ref, *, n_rows, tn, compute_dtype):
    # Fallback BN pass 1 ("parallel"): linear + per-tile partial sum / sumsq.
    i = pl.program_id(0)
    y = jnp.dot(x_ref[...].astype(compute_dtype), wt_ref[...],
                preferred_element_type=jnp.float32)
    rows = i * tn + lax.broadcasted_iota(jnp.int32, (tn, 1), 0)
    ym = jnp.where(rows < n_rows, y, 0.0)              # select-mask, not multiply
    y_ref[...] = ym.astype(y_ref.dtype)
    s = jnp.sum(ym, axis=0, keepdims=True)
    sq = jnp.sum(ym * ym, axis=0, keepdims=True)
    pad = jnp.zeros((6, s.shape[-1]), jnp.float32)     # pad to 8 sublanes
    ps_ref[...] = jnp.concatenate([s, sq, pad], axis=0)


def _affine_kernel(y_ref, ss_ref, o_ref):
    # Fallback BN pass 2: single fused multiply-add with pre-folded scale/shift.
    ss = ss_ref[...]
    o_ref[...] = (y_ref[...] * ss[0:1, :] + ss[1:2, :]).astype(o_ref.dtype)


# --------------------------------------------------------------------------
# Wrapper
# --------------------------------------------------------------------------

def feat_bottleneck_forward(x, weight_t, bias, gamma=None, beta=None,
                            bn_type="ori", *, block_n=256,
                            compute_dtype=jnp.bfloat16,
                            force_two_pass=False):
    """Forward pass of feat_bottleneck.

    x:        [N, F] (any float dtype; cast to compute_dtype in-kernel)
    weight_t: [F, B] pre-transposed Linear weight (ideally stored in compute_dtype)
    bias:     [B]
    gamma, beta: [B] BatchNorm affine params (only used when bn_type == 'bn')
    """
    N, F = x.shape
    F2, B = weight_t.shape
    assert F == F2, "weight_t must be [feature_dim, bottleneck_dim]"

    tn = _round_up(min(block_n, _round_up(N, 8)), 8)   # N tile, multiple of 8 sublanes
    n_pad = _round_up(N, tn)
    num_tiles = n_pad // tn

    # One-time cast only if the stored weight dtype mismatches (init stores bf16).
    wt = weight_t if weight_t.dtype == compute_dtype else weight_t.astype(compute_dtype)

    x_bytes = 2 * tn * F * x.dtype.itemsize            # double-buffered x tiles
    wt_bytes = 2 * F * B * wt.dtype.itemsize           # resident weight
    out_bytes = 2 * tn * B * 4                          # double-buffered out tiles

    if bn_type != "bn":
        # ---- Linear only (type='ori') ----
        b2 = bias.reshape(1, B).astype(jnp.float32)
        est = x_bytes + wt_bytes + out_bytes + B * 4
        return pl.pallas_call(
            functools.partial(_linear_kernel, compute_dtype=compute_dtype),
            out_shape=jax.ShapeDtypeStruct((N, B), jnp.float32),
            grid=(num_tiles,),
            in_specs=[pl.BlockSpec((tn, F), lambda i: (i, 0)),
                      pl.BlockSpec((F, B), lambda i: (0, 0)),
                      pl.BlockSpec((1, B), lambda i: (0, 0))],
            out_specs=pl.BlockSpec((tn, B), lambda i: (i, 0)),
            compiler_params=_compiler_params(("parallel",), est),
        )(x, wt, b2)

    # ---- Linear + BatchNorm1d (training-mode batch statistics) ----
    assert gamma is not None and beta is not None
    gb = jnp.stack([gamma, beta], axis=0).astype(jnp.float32)       # packed (2, B)

    y_scr_bytes = n_pad * B * 4
    fused = (not force_two_pass) and (y_scr_bytes <= _FUSED_Y_SCRATCH_LIMIT)

    if fused:
        last = num_tiles - 1
        est = y_scr_bytes + x_bytes + wt_bytes + out_bytes + 8 * B * 4
        return pl.pallas_call(
            functools.partial(_fused_bn_kernel, n_rows=N, tn=tn,
                              compute_dtype=compute_dtype),
            out_shape=jax.ShapeDtypeStruct((N, B), jnp.float32),
            grid=(2, num_tiles),
            in_specs=[
                # x: tiled during phase 0; parked on the last block during phase 1
                # so it is never re-fetched from HBM.
                pl.BlockSpec((tn, F), lambda p, i: (jnp.where(p == 0, i, last), 0)),
                pl.BlockSpec((F, B), lambda p, i: (0, 0)),   # resident weight
                pl.BlockSpec((2, B), lambda p, i: (0, 0)),   # resident gamma/beta
            ],
            # out: parked on block 0 during phase 0 (never written back there),
            # tiled during phase 1.
            out_specs=pl.BlockSpec((tn, B), lambda p, i: (jnp.where(p == 0, 0, i), 0)),
            scratch_shapes=[pltpu.VMEM((n_pad, B), jnp.float32),   # y (VMEM-resident)
                            pltpu.VMEM((1, B), jnp.float32),       # column sum
                            pltpu.VMEM((1, B), jnp.float32),       # column sumsq
                            pltpu.VMEM((2, B), jnp.float32)],      # folded scale/shift
            compiler_params=_compiler_params(("arbitrary", "arbitrary"), est),
        )(x, wt, gb)

    # ---- Fallback: two pallas_calls (y too large for VMEM residency) ----
    # Pass 1 ("parallel", shards across v7x's 2 TensorCores): linear + partial stats.
    est1 = x_bytes + wt_bytes + out_bytes + 2 * 8 * B * 4
    y, psums = pl.pallas_call(
        functools.partial(_linear_psum_kernel, n_rows=N, tn=tn,
                          compute_dtype=compute_dtype),
        out_shape=(jax.ShapeDtypeStruct((N, B), jnp.float32),
                   jax.ShapeDtypeStruct((num_tiles, 8, B), jnp.float32)),
        grid=(num_tiles,),
        in_specs=[pl.BlockSpec((tn, F), lambda i: (i, 0)),
                  pl.BlockSpec((F, B), lambda i: (0, 0))],
        out_specs=(pl.BlockSpec((tn, B), lambda i: (i, 0)),
                   pl.BlockSpec((None, 8, B), lambda i: (i, 0, 0))),
        compiler_params=_compiler_params(("parallel",), est1),
    )(x, wt)

    # Tiny (num_tiles, B) reduction + affine fold in plain JAX (negligible).
    col_sum = jnp.sum(psums[:, 0, :], axis=0)
    col_sumsq = jnp.sum(psums[:, 1, :], axis=0)
    mean = col_sum / N
    var = col_sumsq / N - mean * mean                   # biased variance
    scale = gamma.astype(jnp.float32) * lax.rsqrt(var + 1e-5)
    shift = beta.astype(jnp.float32) - mean * scale
    ss = jnp.stack([scale, shift], axis=0)              # (2, B)

    # Pass 2 ("parallel"): pure elementwise FMA with a larger N tile.
    tn2 = _round_up(min(max(block_n, 1024), _round_up(N, 8)), 8)
    nt2 = pl.cdiv(N, tn2)
    est2 = 4 * tn2 * B * 4 + 2 * B * 4
    return pl.pallas_call(
        _affine_kernel,
        out_shape=jax.ShapeDtypeStruct((N, B), jnp.float32),
        grid=(nt2,),
        in_specs=[pl.BlockSpec((tn2, B), lambda i: (i, 0)),
                  pl.BlockSpec((2, B), lambda i: (0, 0))],
        out_specs=pl.BlockSpec((tn2, B), lambda i: (i, 0)),
        compiler_params=_compiler_params(("parallel",), est2),
    )(y, ss)


# --------------------------------------------------------------------------
# Init + reference
# --------------------------------------------------------------------------

def init_params(key, feature_dim, bottleneck_dim, param_dtype=jnp.bfloat16):
    """Mirrors init_weights / nn.BatchNorm1d defaults.  The weight is transposed
    once at init and stored as [F, B] in the MXU compute dtype (default bf16) so
    the forward pass never pays an HBM transpose or cast."""
    kw, kg = jax.random.split(key)
    std = (2.0 / (feature_dim + bottleneck_dim)) ** 0.5           # xavier_normal_
    weight = std * jax.random.normal(kw, (bottleneck_dim, feature_dim), jnp.float32)
    weight_t = weight.T.astype(param_dtype)                       # [F, B], stored once
    bias = jnp.zeros((bottleneck_dim,), jnp.float32)
    gamma = 1.0 + 0.02 * jax.random.normal(kg, (bottleneck_dim,), jnp.float32)
    beta = jnp.zeros((bottleneck_dim,), jnp.float32)
    return weight_t, bias, gamma, beta


def reference_forward(x, weight_t, bias, gamma, beta, bn_type):
    y = x.astype(jnp.float32) @ weight_t.astype(jnp.float32) + bias
    if bn_type == "bn":
        mean = jnp.mean(y, axis=0, keepdims=True)
        var = jnp.mean((y - mean) ** 2, axis=0, keepdims=True)
        y = (y - mean) / jnp.sqrt(var + 1e-5) * gamma + beta
    return y


# --------------------------------------------------------------------------
# Self-test
# --------------------------------------------------------------------------

if __name__ == "__main__":
    key = jax.random.PRNGKey(0)
    kx, kp, kx2 = jax.random.split(key, 3)

    feature_dim, bottleneck_dim = 32, 256

    # --- f32 params / f32 compute: tight-tolerance checks ---
    w32, b32, g32, be32 = init_params(kp, feature_dim, bottleneck_dim,
                                      param_dtype=jnp.float32)

    N = 8
    x = jax.random.normal(kx, (N, feature_dim), jnp.float32)
    out = feat_bottleneck_forward(x, w32, b32, bn_type="ori",
                                  compute_dtype=jnp.float32)
    jax.block_until_ready(out)
    ref = reference_forward(x, w32, b32, g32, be32, "ori")
    assert out.shape == (N, bottleneck_dim)
    assert jnp.allclose(out, ref, atol=1e-4, rtol=1e-4), "ori f32 mismatch"

    # Fused BN path: multiple N tiles + partial (masked) last block.
    N2 = 40
    x2 = jax.random.normal(kx2, (N2, feature_dim), jnp.float32)
    ref_bn = reference_forward(x2, w32, b32, g32, be32, "bn")
    out_bn = feat_bottleneck_forward(x2, w32, b32, g32, be32, bn_type="bn",
                                     block_n=16, compute_dtype=jnp.float32)
    jax.block_until_ready(out_bn)
    assert out_bn.shape == (N2, bottleneck_dim)
    assert jnp.allclose(out_bn, ref_bn, atol=1e-3, rtol=1e-3), "fused bn mismatch"

    # Two-pass fallback path (forced) — exercises the parallel partial-stats pass.
    out_bn_tp = feat_bottleneck_forward(x2, w32, b32, g32, be32, bn_type="bn",
                                        block_n=16, compute_dtype=jnp.float32,
                                        force_two_pass=True)
    jax.block_until_ready(out_bn_tp)
    assert jnp.allclose(out_bn_tp, ref_bn, atol=1e-3, rtol=1e-3), "two-pass bn mismatch"

    # --- default path: bf16 weight storage + bf16 MXU compute (f32 accumulate) ---
    wb, bb, gbb, beb = init_params(kp, feature_dim, bottleneck_dim)   # bf16 weight
    ref_ob = reference_forward(x2, wb, bb, gbb, beb, "ori")
    out_ob = feat_bottleneck_forward(x2, wb, bb, bn_type="ori")
    jax.block_until_ready(out_ob)
    assert jnp.allclose(out_ob, ref_ob, atol=5e-2, rtol=5e-2), "ori bf16 mismatch"

    ref_bnb = reference_forward(x2, wb, bb, gbb, beb, "bn")
    out_bnb = feat_bottleneck_forward(x2, wb, bb, gbb, beb, bn_type="bn")
    jax.block_until_ready(out_bnb)
    assert jnp.allclose(out_bnb, ref_bnb, atol=5e-2, rtol=5e-2), "bn bf16 mismatch"

    print("KERNEL_OK")
</pallas_src>

<mosaic_0001>
module attributes {stable_mosaic.version = 11 : i64} {
  func.func @_linear_kernel(%arg0: i32, %arg1: memref<8x32xf32, #tpu.memory_space<vmem>>, %arg2: memref<32x256xf32, #tpu.memory_space<vmem>>, %arg3: memref<1x256xf32, #tpu.memory_space<vmem>>, %arg4: memref<8x256xf32, #tpu.memory_space<vmem>>) attributes {dimension_semantics = [#tpu.dimension_semantics<parallel>], iteration_bounds = array<i64: 1>, scalar_prefetch = 0 : i64, scratch_operands = 0 : i64, tpu.core_type = #tpu.core_type<tc>, window_params = [{transform_indices = @transform_0, window_bounds = array<i64: 8, 32>}, {pipeline_mode = #tpu.pipeline_mode<synchronous>, transform_indices = @transform_1, window_bounds = array<i64: 32, 256>}, {pipeline_mode = #tpu.pipeline_mode<synchronous>, transform_indices = @transform_2, window_bounds = array<i64: 1, 256>}, {transform_indices = @transform_3, window_bounds = array<i64: 8, 256>}]} {
    %c0 = arith.constant 0 : index
    %c0_0 = arith.constant 0 : index
    %0 = vector.load %arg1[%c0, %c0_0] : memref<8x32xf32, #tpu.memory_space<vmem>>, vector<8x32xf32>
    %c0_1 = arith.constant 0 : index
    %c0_2 = arith.constant 0 : index
    %1 = vector.load %arg2[%c0_1, %c0_2] : memref<32x256xf32, #tpu.memory_space<vmem>>, vector<32x256xf32>
    %cst = arith.constant dense<0.000000e+00> : vector<8x256xf32>
    %2 = tpu.matmul %0, %1, %cst {dimension_numbers = #tpu.dot_dimension_numbers<[1], [0], [0], [1], [0, 0, 1, 1], [], []>} : vector<8x32xf32>, vector<32x256xf32>, vector<8x256xf32> -> vector<8x256xf32>
    %c0_3 = arith.constant 0 : index
    %c0_4 = arith.constant 0 : index
    %3 = vector.load %arg3[%c0_3, %c0_4] : memref<1x256xf32, #tpu.memory_space<vmem>>, vector<1x256xf32>
    %4 = vector.broadcast %3 : vector<1x256xf32> to vector<8x256xf32>
    %5 = arith.addf %2, %4 : vector<8x256xf32>
    %c0_5 = arith.constant 0 : index
    %c0_6 = arith.constant 0 : index
    %6 = vector.load %arg4[%c0_5, %c0_6] : memref<8x256xf32, #tpu.memory_space<vmem>>, vector<8x256xf32>
    tpu.vector_store %arg4[%c0_5, %c0_6], %5 {strides = array<i32>} : memref<8x256xf32, #tpu.memory_space<vmem>>, vector<8x256xf32>,
    return
  }
  func.func @transform_0(%arg0: i32) -> (i32, i32) {
    %c0_i32 = arith.constant 0 : i32
    %c0_i32_0 = arith.constant 0 : i32
    return %arg0, %c0_i32 : i32, i32
  }
  func.func @transform_1(%arg0: i32) -> (i32, i32) {
    %c0_i32 = arith.constant 0 : i32
    %c0_i32_0 = arith.constant 0 : i32
    %c0_i32_1 = arith.constant 0 : i32
    return %c0_i32, %c0_i32_0 : i32, i32
  }
  func.func @transform_2(%arg0: i32) -> (i32, i32) {
    %c0_i32 = arith.constant 0 : i32
    %c0_i32_0 = arith.constant 0 : i32
    %c0_i32_1 = arith.constant 0 : i32
    return %c0_i32, %c0_i32_0 : i32, i32
  }
  func.func @transform_3(%arg0: i32) -> (i32, i32) {
    %c0_i32 = arith.constant 0 : i32
    %c0_i32_0 = arith.constant 0 : i32
    return %arg0, %c0_i32 : i32, i32
  }
}

</mosaic_0001>

<bundles_post_ra>
// kernel: tpu_custom_call.1
= control target key start
LH: loop header
LB: loop body
LE: loop exit
PB: predicated region body
PF: predicated region fallthrough
CT: control target
= control target key end

     0   :  { %8 = vsyncpa [#allocation3], 0  ;;  %s314_s0 = inlined_call_operand.hbm [shape: f32[8,32], index: 0, kind: input, shape index: {}]   ;;  %s315_s1 = inlined_call_operand.hbm [shape: f32[32,256], index: 1, kind: input, shape index: {}]   ;;  %s316_s2 = inlined_call_operand.vmem [shape: f32[1,256], index: 2, kind: input, shape index: {}]   ;;  %s317_s3 = inlined_call_operand.hbm [shape: f32[8,256], index: 3, kind: output, shape index: {}]  }
   0x1   :  { %9 = vsyncpa [#allocation6], 0 }
   0x2   :  { %10 = vsyncpa [#allocation4], 0  ;;  %s242_s12 = smov [#allocation2]   ;;  %s243_s14 = smov [#allocation5]  }
   0x3   :  { %s17_s13 = sshll.u32 %s242_s12, 4  ;;  %s26_s15 = sshll.u32 %s243_s14, 4  ;;  %s18_s13 = int_to_ptr.vmem [resolvable:$true] %s17_s13  ;;  %s268_s15 = int_to_ptr.vmem [resolvable:$true] %s26_s15 }
   0x4   :  { %s170_s18 = scalar_lea.hbm %s314_s0, 128 }
   0x5   :  { %p171_p0 = scmp.ne.s32.totalorder %s314_s0, %s170_s18  ;;  %p174_p1 = scmp.lt.u32.totalorder %s170_s18, %s314_s0 }
   0x7   :  { %p176_p2 = pnand %p174_p1, %p171_p0 }
   0x9   :  { %179 = shalt.err (!%p176_p2)
}
   0xa   :  { %s180_s23 = scalar_lea.vmem %s18_s13, 128  ;;  %p185_p4 = scmp.lt.s32.totalorder %s18_s13, %s18_s13 }
   0xb   :  { %p181_p3 = scmp.ne.s32.totalorder %s18_s13, %s180_s23  ;;  %p186_p5 = scmp.lt.s32.totalorder %s180_s23, %s180_s23 }
   0xd   :  { %p187_p6 = por %p186_p5, %p185_p4 }
   0xf   :  { %p188_p7 = pnand %p187_p6, %p181_p3 }
  0x11   :  { %191 = shalt.err (!%p188_p7)
}
  0x12   :  { %20 = dma.hbm_to_vmem [thread:$0]  %s314_s0, 128, %s18_s13, [#allocation3]  }
  0x13   :  { %s192_s28 = scalar_lea.hbm %s315_s1, 1024 }
  0x14   :  { %p193_p8 = scmp.ne.s32.totalorder %s315_s1, %s192_s28  ;;  %p196_p9 = scmp.lt.u32.totalorder %s192_s28, %s315_s1 }
  0x16   :  { %p198_p10 = pnand %p196_p9, %p193_p8 }
  0x18   :  { %201 = shalt.err (!%p198_p10)
}
  0x19   :  { %s202_s6 = scalar_lea.vmem %s268_s15, 1024  ;;  %p207_p12 = scmp.lt.s32.totalorder %s268_s15, %s268_s15 }
  0x1a   :  { %p203_p11 = scmp.ne.s32.totalorder %s268_s15, %s202_s6  ;;  %p208_p13 = scmp.lt.s32.totalorder %s202_s6, %s202_s6 }
  0x1c   :  { %p209_p0 = por %p208_p13, %p207_p12 }
  0x1e   :  { %p210_p1 = pnand %p209_p0, %p203_p11 }
  0x20   :  { %213 = shalt.err (!%p210_p1)
}
  0x21   :  { %s244_s0 = smov 256   ;;  %s245_s7 = smov 16  }
  0x22   :  { %32 = dma.hbm_to_vmem [thread:$0]  %s315_s1, 1024, %s268_s15, [#allocation6], %s244_s0, %s244_s0, %s245_s7  }
  0x23   :  { %236 = dma.done.wait [#allocation3], 128  }
  0x24   :  { %237 = vsyncadd [#allocation3], 4294967168 }
  0x25   :  { %238 = dma.done.wait [#allocation6], 1024  }
  0x26   :  { %239 = vsyncadd [#allocation6], 4294966272  ;;  %v246_v0 = vmov 0.0   ;;  %v43_v1 = vld [vmem:[#allocation5 + $0x8] sm:$0xff]  ;;  %v45_v2 = vld [vmem:[#allocation5 + $0x18] sm:$0xff]  ;;  %vm62_vm0 = vcmask 261120   ;;  %v52_v14 = vlaneseq }
  0x27   :  { %130 = vmatprep.mubr.f32.mxu0 %v246_v0  ;;  %v42_v3 = vld [vmem:[#allocation5] sm:$0xff]  ;;  %v156_v4 = vpack.c.bf16 %v45_v2, %v43_v1  ;;  %v44_v5 = vld [vmem:[#allocation5 + $0x10] sm:$0xff]  ;;  %v47_v6 = vld [vmem:[#allocation5 + $0x28] sm:$0xff]  ;;  %s247_s11 = smov [#allocation7]  }
  0x28   :  { %v49_v7 = vld [vmem:[#allocation5 + $0x38] sm:$0xff]  ;;  %v158_v8 = vpack.c.bf16 %v44_v5, %v42_v3  ;;  %v46_v10 = vld [vmem:[#allocation5 + $0x20] sm:$0xff]  ;;  %v48_v11 = vld [vmem:[#allocation5 + $0x30] sm:$0xff]  ;;  %v53_v15 = vshrl.u32 %v52_v14, 7  ;;  %s145_s12 = sshll.u32 %s247_s11, 4  ;;  %s146_s12 = int_to_ptr.vmem [resolvable:$true] %s145_s12 }
  0x29   :  { %v160_v9 = vpack.c.bf16 %v49_v7, %v47_v6  ;;  %157 = vmatprep.subr.bf16.mxu0 %v156_v4  ;;  %v162_v12 = vpack.c.bf16 %v48_v11, %v46_v10  ;;  %v41_v13 = vld [vmem:[#allocation2] sm:$0xff]  ;;  %s214_s13 = scalar_lea.vmem %s146_s12, 256  ;;  %p219_p3 = scmp.lt.s32.totalorder %s146_s12, %s146_s12 }
  0x2a   :  { %159 = vmatpush1.bf16.msra.mxu0 %v158_v8  ;;  %v54_v16 = vsub.s32 0, %v53_v15  ;;  %v50_v17 = vld [vmem:[%s316_s2] sm:$0x3]  ;;  %v58_v18 = vsub.s32 1, %v53_v15  ;;  %p215_p2 = scmp.ne.s32.totalorder %s146_s12, %s214_s13  ;;  %p220_p4 = scmp.lt.s32.totalorder %s214_s13, %s214_s13 }
  0x2b   :  { %161 = vmatprep.subr.bf16.mxu0 %v160_v9 }
  0x2c   :  { %v55_v19 = vrot.slane %v50_v17, %v54_v16  ;;  %v59_v20 = vrot.slane %v50_v17, %v58_v18  ;;  %p221_p5 = por %p220_p4, %p219_p3 }
  0x2e   :  { %163 = vmatpush1.bf16.msra.mxu0 %v162_v12  ;;  %p222_p6 = pnand %p221_p5, %p215_p2 }
  0x31   :  { %155 = vmatmul.mubr.msk.f32.vlgmr.msra.gmra.mrb[0].mxu0 %vm62_vm0, %v41_v13 }
 0x104   :  { %v132_v21 = vpop.f32.mrb[0].mxu0 }
 0x105   :  { %v133_v22 = vadd.f32 %v132_v21, %v55_v19  ;;  %v134_v23 = vpop.f32.mrb[1].mxu0 }
 0x106   :  { %v135_v24 = vadd.f32 %v134_v23, %v59_v20 }
 0x107   :  { %137 = vst [vmem:[#allocation7] sm:$0xff] %v133_v22 }
 0x108   :  { %138 = vst [vmem:[#allocation7 + $0x8] sm:$0xff] %v135_v24 }
 0x109   :  { %225 = shalt.err (!%p222_p6)
}
 0x10a   :  { %s226_s15 = scalar_lea.hbm %s317_s3, 256 }
 0x10b   :  { %p227_p7 = scmp.ne.s32.totalorder %s317_s3, %s226_s15  ;;  %p230_p8 = scmp.lt.u32.totalorder %s226_s15, %s317_s3 }
 0x10d   :  { %p232_p9 = pnand %p230_p8, %p227_p7 }
 0x10f   :  { %235 = shalt.err (!%p232_p9)
}
 0x110   :  { %148 = dma.vmem_to_hbm [thread:$0]  %s146_s12, 256, %s317_s3, [#allocation4]  }
 0x111   :  { %240 = dma.done.wait [#allocation4], 256  }
 0x112   :  { %241 = vsyncadd [#allocation4], 4294967040 }
 0x113   :  { %152 = vsyncpa [#allocation3], 1 }
 0x114   :  { %153 = vsyncpa [#allocation6], 1 }
 0x115   :  { %154 = vsyncpa [#allocation4], 1 }

</bundles_post_ra>
